<compile_context>
chip_gen: v7x
topology: tpu7x:2x2x1
jax: 0.10.0
libtpu: 0.0.40
codegen_flags: <defaults>
</compile_context>

<pallas_src>
import jax
import jax.numpy as jnp
from jax import lax
from jax.experimental import pallas as pl
from jax.experimental.pallas import tpu as pltpu


def _batch_hard_kernel(xc_ref, xa_ref, nc_ref, na_ref, lc_ref, la_ref,
                       w_ref, b_ref, diff_ref, fc_ref, maxp_ref, minn_ref):
    i = pl.program_id(0)            # anchor tile (lanes)          -- parallel
    c = pl.program_id(1)            # candidate chunk (sublanes)   -- reduction
    TC, D = xc_ref.shape
    TB = xa_ref.shape[0]

    @pl.when(c == 0)
    def _init():
        maxp_ref[...] = jnp.zeros_like(maxp_ref)
        minn_ref[...] = jnp.full_like(minn_ref, 1e16)

    # ---- pairwise SQUARED distances via the Gram identity (MXU) ----------
    # Anchor operand is the same (TB, D) block used for the fc head below; no
    # transposed copy of x is ever materialized.
    gram = lax.dot_general(xc_ref[...], xa_ref[...],
                           (((1,), (1,)), ((), ())),
                           preferred_element_type=jnp.float32)      # (TC, TB)
    sq = nc_ref[...] + na_ref[...] - 2.0 * gram
    sq = jnp.maximum(sq, 0.0) + D * 1e-16     # clamp cancellation; eps = D*1e-16

    # ---- masks (anchors in lanes -> per-anchor reductions over sublanes) --
    same = lc_ref[...] == la_ref[...]                                 # (TC, TB)
    rows = lax.broadcasted_iota(jnp.int32, (TC, TB), 0) + c * TC      # candidate id
    cols = lax.broadcasted_iota(jnp.int32, (TC, TB), 1) + i * TB      # anchor id
    positive = jnp.logical_xor(same, rows == cols)   # same identity, not self

    # ---- batch-hard mining on squared distances (sqrt is monotone) --------
    maxp_ref[...] = jnp.maximum(
        maxp_ref[...],
        jnp.max(jnp.where(positive, sq, 0.0), axis=0, keepdims=True))
    minn_ref[...] = jnp.minimum(
        minn_ref[...],
        jnp.min(jnp.where(same, jnp.float32(1e16), sq), axis=0, keepdims=True))

    @pl.when(c == pl.num_programs(1) - 1)
    def _finalize():
        furthest_positive = jnp.sqrt(maxp_ref[...])                   # (1, TB)
        closest_negative = jnp.sqrt(minn_ref[...])                    # (1, TB)
        d = furthest_positive - closest_negative
        # soft margin: numerically-stable softplus
        diff_ref[...] = jnp.maximum(d, 0.0) + jnp.log1p(jnp.exp(-jnp.abs(d)))
        # fc head for this tile's anchors (MXU), lane-dense padded width.
        # (optional bf16 cast of the fc operands left out to keep f32-exact
        #  parity with the reference head)
        fc_ref[...] = (jnp.dot(xa_ref[...], w_ref[...],
                               preferred_element_type=jnp.float32)
                       + b_ref[...])


def _pick_anchor_tile(B):
    # lane (column) tile for anchors; >1 tile -> "parallel" axis feeds both
    # TensorCores on v7x; 256 fills the 2x256x256 MXU N dim on v6e/v7x.
    if B > 256 and B % 256 == 0:
        return 256
    if B > 128 and B % 128 == 0:
        return 128
    return B


def _pick_candidate_chunk(B):
    # sublane (row) chunk; bounds VMEM for large B via the "arbitrary" axis.
    if B > 512 and B % 512 == 0:
        return 512
    return B


def _vmem_limit_bytes(TB, TC, D, WVp):
    f32 = 4
    dbl = 2  # pipeline double-buffering
    need = dbl * (TC * D + TB * D + D * WVp + 8 * WVp) * f32       # x blocks + fc params
    need += dbl * 4 * max(TC, 8) * 128 * f32                        # norms / labels (lane-padded)
    need += dbl * (8 * TB + TB * WVp) * f32                         # outputs
    need += 2 * 8 * TB * f32                                        # scratch accumulators
    need += 8 * TC * TB * f32                                       # gram / sq / mask temporaries
    need = int(need * 1.5) + (4 << 20)
    try:
        cap = int(getattr(pltpu.get_tpu_info(), "vmem_capacity_bytes", 64 << 20))
    except Exception:
        cap = 64 << 20
    return int(max(32 << 20, min(need, (cap * 3) // 4)))


def prepare_fc_params(w, b):
    """Pad nn.Linear params (torch layout w:(WV,D), b:(WV,)) once at init to a
    lane-dense (D, WVp) / (1, WVp) layout, WVp a multiple of 128."""
    wv, _ = w.shape
    wvp = max(((wv + 127) // 128) * 128, 128)
    w_t = jnp.pad(w.T, ((0, 0), (0, wvp - wv)))
    b_p = jnp.pad(b.reshape(1, wv), ((0, 0), (0, wvp - wv)))
    return w_t, b_p


def batch_hard(x, label, w_t, b_p, wv_size):
    """x: (B, D) f32, label: (B,) int, w_t: (D, WVp) f32 padded, b_p: (1, WVp).

    Returns (diff: (B,) f32, fc_out: (B, wv_size) f32).
    """
    B, D = x.shape
    WVp = w_t.shape[1]

    TB = _pick_anchor_tile(B)
    TC = _pick_candidate_chunk(B)
    nT = B // TB
    nC = B // TC

    # precomputed once per call (tiny): squared norms and label layouts
    norms_col = jnp.sum(x * x, axis=1, keepdims=True)       # (B, 1) candidates
    norms_row = norms_col.reshape(1, B)                      # (1, B) anchors
    lab_col = label.astype(jnp.int32).reshape(B, 1)
    lab_row = label.astype(jnp.int32).reshape(1, B)

    cost = pl.CostEstimate(
        flops=int(2 * B * B * D + 2 * B * D * WVp + 8 * B * B),
        transcendentals=int(4 * B),                          # 2 sqrt + exp + log1p per anchor
        bytes_accessed=int(4 * (B * D * (nT + nC) + D * WVp + B * WVp + 6 * B)),
    )

    diff_out, fc_out = pl.pallas_call(
        _batch_hard_kernel,
        out_shape=(
            jax.ShapeDtypeStruct((1, B), jnp.float32),       # diff, lane-dense
            jax.ShapeDtypeStruct((B, WVp), jnp.float32),     # fc, lane-dense
        ),
        grid_spec=pltpu.PrefetchScalarGridSpec(
            num_scalar_prefetch=0,
            grid=(nT, nC),
            in_specs=[
                pl.BlockSpec((TC, D), lambda i, c: (c, 0)),    # x candidate chunk
                pl.BlockSpec((TB, D), lambda i, c: (i, 0)),    # x anchor tile
                pl.BlockSpec((TC, 1), lambda i, c: (c, 0)),    # |x|^2 candidates
                pl.BlockSpec((1, TB), lambda i, c: (0, i)),    # |x|^2 anchors
                pl.BlockSpec((TC, 1), lambda i, c: (c, 0)),    # labels candidates
                pl.BlockSpec((1, TB), lambda i, c: (0, i)),    # labels anchors
                pl.BlockSpec((D, WVp), lambda i, c: (0, 0)),   # fc weight (padded)
                pl.BlockSpec((1, WVp), lambda i, c: (0, 0)),   # fc bias (padded)
            ],
            out_specs=[
                pl.BlockSpec((1, TB), lambda i, c: (0, i)),
                pl.BlockSpec((TB, WVp), lambda i, c: (i, 0)),
            ],
            scratch_shapes=[
                pltpu.VMEM((1, TB), jnp.float32),              # running max positive sq
                pltpu.VMEM((1, TB), jnp.float32),              # running min negative sq
            ],
        ),
        compiler_params=pltpu.CompilerParams(
            dimension_semantics=("parallel", "arbitrary"),
            vmem_limit_bytes=_vmem_limit_bytes(TB, TC, D, WVp),
        ),
        cost_estimate=cost,
    )(x, x, norms_col, norms_row, lab_col, lab_row, w_t, b_p)

    # Downstream consumers that accept the padded width can skip this slice.
    return diff_out[0], fc_out[:, :wv_size]


def _reference(x, label, w, b):
    """Pure-JAX reference mirroring the PyTorch forward (euclidean, soft margin)."""
    B = x.shape[0]
    diffs = x[:, None, :] - x[None, :, :]
    dists = jnp.sqrt(jnp.sum(diffs ** 2 + 1e-16, axis=-1))
    same = label[:, None] == label[None, :]
    positive = jnp.logical_xor(same, jnp.eye(B, dtype=bool))
    furthest_positive = jnp.max(dists * positive.astype(jnp.float32), axis=1)
    closest_negative = jnp.min(dists + 1e8 * same.astype(jnp.float32), axis=1)
    diff = furthest_positive - closest_negative
    diff = jax.nn.softplus(diff)
    return diff, x @ w.T + b


if __name__ == "__main__":
    # small, deterministic shapes: batch=8, backbone_nhash=32, wv_size=16
    B, D, WV = 8, 32, 16
    key = jax.random.PRNGKey(0)
    kx, kl, kw, kb = jax.random.split(key, 4)

    x = jax.random.normal(kx, (B, D), dtype=jnp.float32)
    label = jax.random.randint(kl, (B,), 0, 4, dtype=jnp.int32)
    # nn.Linear(backbone_nhash, wv_size): weight (WV, D), bias (WV,)
    w = jax.random.normal(kw, (WV, D), dtype=jnp.float32) * 0.05
    b = jax.random.normal(kb, (WV,), dtype=jnp.float32) * 0.05

    w_t, b_p = prepare_fc_params(w, b)          # padded once (init-time), not per call
    diff, fc_out = batch_hard(x, label, w_t, b_p, WV)
    jax.block_until_ready((diff, fc_out))

    ref_diff, ref_fc = _reference(x, label, w, b)
    assert jnp.allclose(diff, ref_diff, atol=1e-4, rtol=1e-4)
    assert jnp.allclose(fc_out, ref_fc, atol=1e-4, rtol=1e-4)

    print("KERNEL_OK")
</pallas_src>

<mosaic_0001>
module attributes {stable_mosaic.version = 11 : i64} {
  func.func @_batch_hard_kernel(%arg0: i32, %arg1: i32, %arg2: memref<8x32xf32, #tpu.memory_space<vmem>>, %arg3: memref<8x32xf32, #tpu.memory_space<vmem>>, %arg4: memref<8x1xf32, #tpu.memory_space<vmem>>, %arg5: memref<1x8xf32, #tpu.memory_space<vmem>>, %arg6: memref<8x1xi32, #tpu.memory_space<vmem>>, %arg7: memref<1x8xi32, #tpu.memory_space<vmem>>, %arg8: memref<32x128xf32, #tpu.memory_space<vmem>>, %arg9: memref<1x128xf32, #tpu.memory_space<vmem>>, %arg10: memref<1x8xf32, #tpu.memory_space<vmem>>, %arg11: memref<8x128xf32, #tpu.memory_space<vmem>>, %arg12: memref<1x8xf32, #tpu.memory_space<vmem>>, %arg13: memref<1x8xf32, #tpu.memory_space<vmem>>) attributes {dimension_semantics = [#tpu.dimension_semantics<parallel>, #tpu.dimension_semantics<arbitrary>], iteration_bounds = array<i64: 1, 1>, scalar_prefetch = 0 : i64, scratch_operands = 2 : i64, tpu.core_type = #tpu.core_type<tc>, window_params = [{transform_indices = @transform_0, window_bounds = array<i64: 8, 32>}, {transform_indices = @transform_1, window_bounds = array<i64: 8, 32>}, {transform_indices = @transform_2, window_bounds = array<i64: 8, 1>}, {transform_indices = @transform_3, window_bounds = array<i64: 1, 8>}, {transform_indices = @transform_4, window_bounds = array<i64: 8, 1>}, {transform_indices = @transform_5, window_bounds = array<i64: 1, 8>}, {pipeline_mode = #tpu.pipeline_mode<synchronous>, transform_indices = @transform_6, window_bounds = array<i64: 32, 128>}, {pipeline_mode = #tpu.pipeline_mode<synchronous>, transform_indices = @transform_7, window_bounds = array<i64: 1, 128>}, {transform_indices = @transform_8, window_bounds = array<i64: 1, 8>}, {transform_indices = @transform_9, window_bounds = array<i64: 8, 128>}]} {
    %c0_i32 = arith.constant 0 : i32
    %0 = arith.cmpi eq, %arg1, %c0_i32 : i32
    %1 = arith.extui %0 : i1 to i32
    %c0_i32_0 = arith.constant 0 : i32
    %2 = arith.cmpi ne, %1, %c0_i32_0 : i32
    scf.if %2 {
      %cst_30 = arith.constant 0.000000e+00 : f32
      %50 = vector.broadcast %cst_30 : f32 to vector<1x8xf32>
      %c0_31 = arith.constant 0 : index
      %c0_32 = arith.constant 0 : index
      %51 = vector.load %arg12[%c0_31, %c0_32] : memref<1x8xf32, #tpu.memory_space<vmem>>, vector<1x8xf32>
      tpu.vector_store %arg12[%c0_31, %c0_32], %50 {strides = array<i32>} : memref<1x8xf32, #tpu.memory_space<vmem>>, vector<1x8xf32>,
      %cst_33 = arith.constant 1.000000e+16 : f32
      %52 = vector.broadcast %cst_33 : f32 to vector<1x8xf32>
      %c0_34 = arith.constant 0 : index
      %c0_35 = arith.constant 0 : index
      %53 = vector.load %arg13[%c0_34, %c0_35] : memref<1x8xf32, #tpu.memory_space<vmem>>, vector<1x8xf32>
      tpu.vector_store %arg13[%c0_34, %c0_35], %52 {strides = array<i32>} : memref<1x8xf32, #tpu.memory_space<vmem>>, vector<1x8xf32>,
    } else {
    }
    %c0 = arith.constant 0 : index
    %c0_1 = arith.constant 0 : index
    %3 = vector.load %arg2[%c0, %c0_1] : memref<8x32xf32, #tpu.memory_space<vmem>>, vector<8x32xf32>
    %c0_2 = arith.constant 0 : index
    %c0_3 = arith.constant 0 : index
    %4 = vector.load %arg3[%c0_2, %c0_3] : memref<8x32xf32, #tpu.memory_space<vmem>>, vector<8x32xf32>
    %cst = arith.constant dense<0.000000e+00> : vector<8x8xf32>
    %5 = tpu.matmul %3, %4, %cst {dimension_numbers = #tpu.dot_dimension_numbers<[1], [1], [0], [0], [0, 0, 1, 0], [], []>} : vector<8x32xf32>, vector<8x32xf32>, vector<8x8xf32> -> vector<8x8xf32>
    %c0_4 = arith.constant 0 : index
    %c0_5 = arith.constant 0 : index
    %6 = vector.load %arg4[%c0_4, %c0_5] : memref<8x1xf32, #tpu.memory_space<vmem>>, vector<8x1xf32>
    %c0_6 = arith.constant 0 : index
    %c0_7 = arith.constant 0 : index
    %7 = vector.load %arg5[%c0_6, %c0_7] : memref<1x8xf32, #tpu.memory_space<vmem>>, vector<1x8xf32>
    %8 = vector.broadcast %6 : vector<8x1xf32> to vector<8x8xf32>
    %9 = vector.broadcast %7 : vector<1x8xf32> to vector<8x8xf32>
    %10 = arith.addf %8, %9 : vector<8x8xf32>
    %cst_8 = arith.constant 2.000000e+00 : f32
    %11 = vector.broadcast %cst_8 : f32 to vector<8x8xf32>
    %12 = arith.mulf %11, %5 : vector<8x8xf32>
    %13 = arith.subf %10, %12 : vector<8x8xf32>
    %cst_9 = arith.constant 0.000000e+00 : f32
    %14 = vector.broadcast %cst_9 : f32 to vector<8x8xf32>
    %15 = arith.maximumf %13, %14 : vector<8x8xf32>
    %cst_10 = arith.constant 3.200000e-15 : f32
    %16 = vector.broadcast %cst_10 : f32 to vector<8x8xf32>
    %17 = arith.addf %15, %16 : vector<8x8xf32>
    %c0_11 = arith.constant 0 : index
    %c0_12 = arith.constant 0 : index
    %18 = vector.load %arg6[%c0_11, %c0_12] : memref<8x1xi32, #tpu.memory_space<vmem>>, vector<8x1xi32>
    %c0_13 = arith.constant 0 : index
    %c0_14 = arith.constant 0 : index
    %19 = vector.load %arg7[%c0_13, %c0_14] : memref<1x8xi32, #tpu.memory_space<vmem>>, vector<1x8xi32>
    %20 = vector.broadcast %18 : vector<8x1xi32> to vector<8x8xi32>
    %21 = vector.broadcast %19 : vector<1x8xi32> to vector<8x8xi32>
    %22 = arith.cmpi eq, %20, %21 : vector<8x8xi32>
    %23 = tpu.iota {dimensions = array<i32: 0>} : vector<8x8xi32>
    %c8_i32 = arith.constant 8 : i32
    %24 = arith.muli %arg1, %c8_i32 : i32
    %25 = vector.broadcast %24 : i32 to vector<8x8xi32>
    %26 = arith.addi %23, %25 : vector<8x8xi32>
    %27 = tpu.iota {dimensions = array<i32: 1>} : vector<8x8xi32>
    %c8_i32_15 = arith.constant 8 : i32
    %28 = arith.muli %arg0, %c8_i32_15 : i32
    %29 = vector.broadcast %28 : i32 to vector<8x8xi32>
    %30 = arith.addi %27, %29 : vector<8x8xi32>
    %31 = arith.cmpi eq, %26, %30 : vector<8x8xi32>
    %32 = arith.xori %22, %31 : vector<8x8xi1>
    %c0_16 = arith.constant 0 : index
    %c0_17 = arith.constant 0 : index
    %33 = vector.load %arg12[%c0_16, %c0_17] : memref<1x8xf32, #tpu.memory_space<vmem>>, vector<1x8xf32>
    %cst_18 = arith.constant 0.000000e+00 : f32
    %34 = vector.broadcast %cst_18 : f32 to vector<8x8xf32>
    %35 = arith.select %32, %17, %34 : vector<8x8xi1>, vector<8x8xf32>
    %cst_19 = arith.constant dense<0xFF800000> : vector<8xf32>
    %36 = vector.multi_reduction <maximumf>, %35, %cst_19 [0] : vector<8x8xf32> to vector<8xf32>
    %37 = vector.shape_cast %36 : vector<8xf32> to vector<1x8xf32>
    %38 = arith.maximumf %33, %37 : vector<1x8xf32>
    %c0_20 = arith.constant 0 : index
    %c0_21 = arith.constant 0 : index
    %39 = vector.load %arg12[%c0_20, %c0_21] : memref<1x8xf32, #tpu.memory_space<vmem>>, vector<1x8xf32>
    tpu.vector_store %arg12[%c0_20, %c0_21], %38 {strides = array<i32>} : memref<1x8xf32, #tpu.memory_space<vmem>>, vector<1x8xf32>,
    %c0_22 = arith.constant 0 : index
    %c0_23 = arith.constant 0 : index
    %40 = vector.load %arg13[%c0_22, %c0_23] : memref<1x8xf32, #tpu.memory_space<vmem>>, vector<1x8xf32>
    %cst_24 = arith.constant 1.000000e+16 : f32
    %41 = vector.broadcast %cst_24 : f32 to vector<8x8xf32>
    %42 = arith.select %22, %41, %17 : vector<8x8xi1>, vector<8x8xf32>
    %cst_25 = arith.constant dense<0x7F800000> : vector<8xf32>
    %43 = vector.multi_reduction <minimumf>, %42, %cst_25 [0] : vector<8x8xf32> to vector<8xf32>
    %44 = vector.shape_cast %43 : vector<8xf32> to vector<1x8xf32>
    %45 = arith.minimumf %40, %44 : vector<1x8xf32>
    %c0_26 = arith.constant 0 : index
    %c0_27 = arith.constant 0 : index
    %46 = vector.load %arg13[%c0_26, %c0_27] : memref<1x8xf32, #tpu.memory_space<vmem>>, vector<1x8xf32>
    tpu.vector_store %arg13[%c0_26, %c0_27], %45 {strides = array<i32>} : memref<1x8xf32, #tpu.memory_space<vmem>>, vector<1x8xf32>,
    %c0_i32_28 = arith.constant 0 : i32
    %47 = arith.cmpi eq, %arg1, %c0_i32_28 : i32
    %48 = arith.extui %47 : i1 to i32
    %c0_i32_29 = arith.constant 0 : i32
    %49 = arith.cmpi ne, %48, %c0_i32_29 : i32
    scf.if %49 {
      %c0_30 = arith.constant 0 : index
      %c0_31 = arith.constant 0 : index
      %50 = vector.load %arg12[%c0_30, %c0_31] : memref<1x8xf32, #tpu.memory_space<vmem>>, vector<1x8xf32>
      %51 = math.sqrt %50 : vector<1x8xf32>
      %c0_32 = arith.constant 0 : index
      %c0_33 = arith.constant 0 : index
      %52 = vector.load %arg13[%c0_32, %c0_33] : memref<1x8xf32, #tpu.memory_space<vmem>>, vector<1x8xf32>
      %53 = math.sqrt %52 : vector<1x8xf32>
      %54 = arith.subf %51, %53 : vector<1x8xf32>
      %cst_34 = arith.constant 0.000000e+00 : f32
      %55 = vector.broadcast %cst_34 : f32 to vector<1x8xf32>
      %56 = arith.maximumf %54, %55 : vector<1x8xf32>
      %57 = math.absf %54 : vector<1x8xf32>
      %cst_35 = arith.constant 0.000000e+00 : f32
      %58 = vector.broadcast %cst_35 : f32 to vector<1x8xf32>
      %59 = arith.subf %58, %57 : vector<1x8xf32>
      %60 = math.exp %59 : vector<1x8xf32>
      %61 = math.log1p %60 : vector<1x8xf32>
      %62 = arith.addf %56, %61 : vector<1x8xf32>
      %c0_36 = arith.constant 0 : index
      %c0_37 = arith.constant 0 : index
      %63 = vector.load %arg10[%c0_36, %c0_37] : memref<1x8xf32, #tpu.memory_space<vmem>>, vector<1x8xf32>
      tpu.vector_store %arg10[%c0_36, %c0_37], %62 {strides = array<i32>} : memref<1x8xf32, #tpu.memory_space<vmem>>, vector<1x8xf32>,
      %c0_38 = arith.constant 0 : index
      %c0_39 = arith.constant 0 : index
      %64 = vector.load %arg3[%c0_38, %c0_39] : memref<8x32xf32, #tpu.memory_space<vmem>>, vector<8x32xf32>
      %c0_40 = arith.constant 0 : index
      %c0_41 = arith.constant 0 : index
      %65 = vector.load %arg8[%c0_40, %c0_41] : memref<32x128xf32, #tpu.memory_space<vmem>>, vector<32x128xf32>
      %cst_42 = arith.constant dense<0.000000e+00> : vector<8x128xf32>
      %66 = tpu.matmul %64, %65, %cst_42 {dimension_numbers = #tpu.dot_dimension_numbers<[1], [0], [0], [1], [0, 0, 1, 1], [], []>} : vector<8x32xf32>, vector<32x128xf32>, vector<8x128xf32> -> vector<8x128xf32>
      %c0_43 = arith.constant 0 : index
      %c0_44 = arith.constant 0 : index
      %67 = vector.load %arg9[%c0_43, %c0_44] : memref<1x128xf32, #tpu.memory_space<vmem>>, vector<1x128xf32>
      %68 = vector.broadcast %67 : vector<1x128xf32> to vector<8x128xf32>
      %69 = arith.addf %66, %68 : vector<8x128xf32>
      %c0_45 = arith.constant 0 : index
      %c0_46 = arith.constant 0 : index
      %70 = vector.load %arg11[%c0_45, %c0_46] : memref<8x128xf32, #tpu.memory_space<vmem>>, vector<8x128xf32>
      tpu.vector_store %arg11[%c0_45, %c0_46], %69 {strides = array<i32>} : memref<8x128xf32, #tpu.memory_space<vmem>>, vector<8x128xf32>,
    } else {
    }
    return
  }
  func.func @transform_0(%arg0: i32, %arg1: i32) -> (i32, i32) {
    %c0_i32 = arith.constant 0 : i32
    %c0_i32_0 = arith.constant 0 : i32
    return %arg1, %c0_i32 : i32, i32
  }
  func.func @transform_1(%arg0: i32, %arg1: i32) -> (i32, i32) {
    %c0_i32 = arith.constant 0 : i32
    %c0_i32_0 = arith.constant 0 : i32
    return %arg0, %c0_i32 : i32, i32
  }
  func.func @transform_2(%arg0: i32, %arg1: i32) -> (i32, i32) {
    %c0_i32 = arith.constant 0 : i32
    %c0_i32_0 = arith.constant 0 : i32
    return %arg1, %c0_i32 : i32, i32
  }
  func.func @transform_3(%arg0: i32, %arg1: i32) -> (i32, i32) {
    %c0_i32 = arith.constant 0 : i32
    %c0_i32_0 = arith.constant 0 : i32
    return %c0_i32, %arg0 : i32, i32
  }
  func.func @transform_4(%arg0: i32, %arg1: i32) -> (i32, i32) {
    %c0_i32 = arith.constant 0 : i32
    %c0_i32_0 = arith.constant 0 : i32
    return %arg1, %c0_i32 : i32, i32
  }
  func.func @transform_5(%arg0: i32, %arg1: i32) -> (i32, i32) {
    %c0_i32 = arith.constant 0 : i32
    %c0_i32_0 = arith.constant 0 : i32
    return %c0_i32, %arg0 : i32, i32
  }
  func.func @transform_6(%arg0: i32, %arg1: i32) -> (i32, i32) {
    %c0_i32 = arith.constant 0 : i32
    %c0_i32_0 = arith.constant 0 : i32
    %c0_i32_1 = arith.constant 0 : i32
    return %c0_i32, %c0_i32_0 : i32, i32
  }
  func.func @transform_7(%arg0: i32, %arg1: i32) -> (i32, i32) {
    %c0_i32 = arith.constant 0 : i32
    %c0_i32_0 = arith.constant 0 : i32
    %c0_i32_1 = arith.constant 0 : i32
    return %c0_i32, %c0_i32_0 : i32, i32
  }
  func.func @transform_8(%arg0: i32, %arg1: i32) -> (i32, i32) {
    %c0_i32 = arith.constant 0 : i32
    %c0_i32_0 = arith.constant 0 : i32
    return %c0_i32, %arg0 : i32, i32
  }
  func.func @transform_9(%arg0: i32, %arg1: i32) -> (i32, i32) {
    %c0_i32 = arith.constant 0 : i32
    %c0_i32_0 = arith.constant 0 : i32
    return %arg0, %c0_i32 : i32, i32
  }
}

</mosaic_0001>

<bundles_post_ra>
// kernel: tpu_custom_call.1
= control target key start
LH: loop header
LB: loop body
LE: loop exit
PB: predicated region body
PF: predicated region fallthrough
CT: control target
= control target key end

     0   :  { %15 = vsyncpa [#allocation5], 0  ;;  %s694_s0 = inlined_call_operand.vmem [shape: f32[8,32], index: 0, kind: input, shape index: {}]   ;;  %s695_s1 = inlined_call_operand.hbm [shape: f32[8,32], index: 1, kind: input, shape index: {}]   ;;  %s696_s2 = inlined_call_operand.vmem [shape: f32[8,1], index: 2, kind: input, shape index: {}]   ;;  %s697_s3 = inlined_call_operand.hbm [shape: f32[1,8], index: 3, kind: input, shape index: {}]   ;;  %s698_s4 = inlined_call_operand.vmem [shape: s32[8,1], index: 4, kind: input, shape index: {}]   ;;  %s699_s5 = inlined_call_operand.hbm [shape: s32[1,8], index: 5, kind: input, shape index: {}]   ;;  %s700_s6 = inlined_call_operand.vmem [shape: f32[32,128], index: 6, kind: input, shape index: {}]   ;;  %s701_s7 = inlined_call_operand.vmem [shape: f32[1,128], index: 7, kind: input, shape index: {}]   ;;  %s702_s8 = inlined_call_operand.hbm [shape: f32[1,8], index: 8, kind: output, shape index: {0}]   ;;  %s703_s9 = inlined_call_operand.hbm [shape: f32[8,128], index: 9, kind: output, shape index: {1}]  }
   0x1   :  { %16 = vsyncpa [#allocation8], 0 }
   0x2   :  { %17 = vsyncpa [#allocation6], 0 }
   0x3   :  { %18 = vsyncpa [#allocation12], 0  ;;  %s542_s30 = smov [#allocation7]   ;;  %s543_s11 = smov [#allocation4]  }
   0x4   :  { %s39_s10 = sshll.u32 %s542_s30, 4  ;;  %s27_s12 = sshll.u32 %s543_s11, 4  ;;  %s40_s10 = int_to_ptr.vmem [resolvable:$true] %s39_s10  ;;  %s28_s12 = int_to_ptr.vmem [resolvable:$true] %s27_s12 }
   0x5   :  { %s424_s15 = scalar_lea.hbm %s697_s3, 16 }
   0x6   :  { %p425_p0 = scmp.ne.s32.totalorder %s697_s3, %s424_s15  ;;  %p428_p1 = scmp.lt.u32.totalorder %s424_s15, %s697_s3 }
   0x8   :  { %p430_p2 = pnand %p428_p1, %p425_p0 }
   0xa   :  { %433 = shalt.err (!%p430_p2)
}
   0xb   :  { %s434_s20 = scalar_lea.vmem %s40_s10, 16  ;;  %s438_s21 = scalar_lea.vmem %s40_s10, 32 }
   0xc   :  { %p435_p3 = scmp.ne.s32.totalorder %s40_s10, %s434_s20  ;;  %p439_p4 = scmp.lt.s32.totalorder %s40_s10, %s40_s10 }
   0xd   :  { %p440_p5 = scmp.lt.s32.totalorder %s438_s21, %s434_s20 }
   0xf   :  { %p441_p6 = por %p440_p5, %p439_p4 }
  0x11   :  { %p442_p7 = pnand %p441_p6, %p435_p3 }
  0x13   :  { %445 = shalt.err (!%p442_p7)
}
  0x14   :  { %42 = dma.hbm_to_vmem [thread:$0]  %s697_s3, 16, %s40_s10, [#allocation8]  }
  0x15   :  { %s446_s26 = scalar_lea.hbm %s695_s1, 128 }
  0x16   :  { %p447_p8 = scmp.ne.s32.totalorder %s695_s1, %s446_s26  ;;  %p450_p9 = scmp.lt.u32.totalorder %s446_s26, %s695_s1 }
  0x18   :  { %p452_p10 = pnand %p450_p9, %p447_p8 }
  0x1a   :  { %455 = shalt.err (!%p452_p10)
}
  0x1b   :  { %s456_s11 = scalar_lea.vmem %s28_s12, 128  ;;  %p461_p12 = scmp.lt.s32.totalorder %s28_s12, %s28_s12 }
  0x1c   :  { %p457_p11 = scmp.ne.s32.totalorder %s28_s12, %s456_s11  ;;  %p462_p13 = scmp.lt.s32.totalorder %s456_s11, %s456_s11 }
  0x1e   :  { %p463_p0 = por %p462_p13, %p461_p12 }
  0x20   :  { %p464_p1 = pnand %p463_p0, %p457_p11 }
  0x22   :  { %467 = shalt.err (!%p464_p1)
}
  0x23   :  { %30 = dma.hbm_to_vmem [thread:$0]  %s695_s1, 128, %s28_s12, [#allocation5]  }
  0x24   :  { %s544_s13 = smov [#allocation9]   ;;  %s468_s17 = scalar_lea.hbm %s699_s5, 16 }
  0x25   :  { %s51_s14 = sshll.u32 %s544_s13, 4  ;;  %p469_p2 = scmp.ne.s32.totalorder %s699_s5, %s468_s17  ;;  %s52_s14 = int_to_ptr.vmem [resolvable:$true] %s51_s14 }
  0x26   :  { %p472_p3 = scmp.lt.u32.totalorder %s468_s17, %s699_s5 }
  0x28   :  { %p474_p4 = pnand %p472_p3, %p469_p2 }
  0x2a   :  { %477 = shalt.err (!%p474_p4)
}
  0x2b   :  { %s478_s22 = scalar_lea.vmem %s52_s14, 16  ;;  %s482_s1 = scalar_lea.vmem %s52_s14, 32 }
  0x2c   :  { %p479_p5 = scmp.ne.s32.totalorder %s52_s14, %s478_s22  ;;  %p483_p6 = scmp.lt.s32.totalorder %s52_s14, %s52_s14 }
  0x2d   :  { %p484_p7 = scmp.lt.s32.totalorder %s482_s1, %s478_s22 }
  0x2f   :  { %p485_p8 = por %p484_p7, %p483_p6 }
  0x31   :  { %p486_p9 = pnand %p485_p8, %p479_p5 }
  0x33   :  { %489 = shalt.err (!%p486_p9)
}
  0x34   :  { %54 = dma.hbm_to_vmem [thread:$0]  %s699_s5, 16, %s52_s14, [#allocation8]  }
  0x35   :  { %534 = dma.done.wait [#allocation5], 128  }
  0x36   :  { %535 = vsyncadd [#allocation5], 4294967168 }
  0x37   :  { %536 = dma.done.wait [#allocation8], 32  }
  0x38   :  { %537 = vsyncadd [#allocation8], 4294967264  ;;  %vm72_vm0 = vcmask 57344   ;;  %v545_v0 = vmov 0.0   ;;  %v546_v1 = vmov 1e+16   ;;  %v182_v16 = vlaneseq }
  0x39   :  { %73 = vst.msk [vmem:[#allocation2] sm:$0x1] %vm72_vm0, %v545_v0  ;;  %74 = vst.msk [vmem:[#allocation3] sm:$0x1] %vm72_vm0, %v546_v1  ;;  %383 = vmatprep.subr.mxu0 %v545_v0  ;;  %vm547_vm1 = vmmov 0   ;;  %v548_v2 = vmov 0.0|0.0  }
  0x3a   :  { %385 = vmatprep.mubr.msk.f32.mxu0 %vm547_vm1, %v545_v0  ;;  %399 = vmatprep.subr.bf16.mxu1 %v548_v2  ;;  %v549_v3 = vmov 0   ;;  %vm77_vm2 = vcmask 261120   ;;  %v76_v4 = vld [vmem:[#allocation4] sm:$0xff]  ;;  %v257_v8 = vld [vmem:[%s700_s6 + $0x10] sm:$0xff]  ;;  %v258_v9 = vld [vmem:[%s700_s6 + $0x18] sm:$0xff]  ;;  %v183_v19 = vshrl.u32 %v182_v16, 7 }
  0x3b   :  { %415 = vset.pattern.permute.xlu0 %v549_v3  ;;  %396 = vmatprep.mubr.msk.f32.mxu1 %vm547_vm1, %v545_v0  ;;  %v75_v5 = vld [vmem:[%s694_s0] sm:$0xff]  ;;  %v256_v7 = vld [vmem:[%s700_s6 + $0x8] sm:$0xff]  ;;  %v403_v12 = vpack.c.bf16 %v258_v9, %v257_v8  ;;  %v188_v20 = vand.u32 127, %v182_v16  ;;  %vm196_vm5 = vcmask 64512  }
  0x3c   :  { %v255_v6 = vld [vmem:[%s700_s6] sm:$0xff]  ;;  %384 = vmatpush3.xpose.msk.msra.mxu0 %vm77_vm2, %v76_v4  ;;  %v372_v14 = vld [vmem:[#allocation7] ss:$0 sm:$0xff]  ;;  %v373_v23 = vld [vmem:[#allocation9] ss:$0 sm:$0xff]  ;;  %s550_s6 = smov [#allocation11]  }
  0x3d   :  { %v400_v10 = vpack.c.bf16 %v256_v7, %v255_v6  ;;  %v154_v11 = vld [vmem:[%s696_s2] sm:$0xff]  ;;  %vm192_vm3 = vcmp.eq.s32.totalorder %v183_v19, %v188_v20  ;;  %s356_s15 = sshll.u32 %s550_s6, 4  ;;  %s357_s15 = int_to_ptr.vmem [resolvable:$true] %s356_s15 }
  0x3e   :  { %158 = vperm.xlu0 %415, %v154_v11   ;;  %v172_v13 = vld [vmem:[%s698_s4] sm:$0xff]  ;;  %s490_s16 = scalar_lea.vmem %s357_s15, 128  ;;  %p495_p11 = scmp.lt.s32.totalorder %s357_s15, %s357_s15 }
  0x3f   :  { %386 = vmatmul.mubr.msk.f32.vlgmr.msra.gmra.mrb[0].mxu0 %vm77_vm2, %v75_v5  ;;  %401 = vmatpush3.bf16.msra.mxu1 %v400_v10  ;;  %v374_v27 = vld [vmem:[%s701_s7] ss:$0 sm:$0xff]  ;;  %p491_p10 = scmp.ne.s32.totalorder %s357_s15, %s490_s16  ;;  %p496_p12 = scmp.lt.s32.totalorder %s490_s16, %s490_s16 }
  0x40   :  { %402 = vmatprep.subr.bf16.mxu1 %v548_v2 }
  0x41   :  { %p497_p13 = por %p496_p12, %p495_p11 }
  0x42   :  { %175 = vperm.xlu0 %415, %v172_v13  }
  0x43   :  { %404 = vmatpush3.bf16.msra.mxu1 %v403_v12  ;;  %p498_p0 = pnand %p497_p13, %p491_p10 }
  0x46   :  { %397 = vmatmul.mubr.msk.f32.vlgmr.msra.gmra.mrb[0].mxu1 %vm77_vm2, %v76_v4 }
  0xbd   :  { %v159_v15 = vpop.permute.xlu0 %158 }
  0xbe   :  { %v167_v17 = vadd.f32 %v372_v14, %v159_v15 }
  0xc1   :  { %v176_v24 = vpop.permute.xlu0 %175 }
  0xc2   :  { %vm181_vm4 = vcmp.eq.s32.totalorder %v176_v24, %v373_v23 }
  0xc3   :  { %vm193_vm6 = vmxor %vm181_vm4, %vm192_vm3 }
 0x112   :  { %v150_v18 = vpop.f32.mrb[0].mxu0 }
 0x113   :  { %v168_v21 = vmul.f32 2.0, %v150_v18  ;;  %v387_v22 = vpop.f32.mrb[1].mxu0 }
 0x115   :  { %v169_v25 = vsub.f32 %v167_v17, %v168_v21 }
 0x117   :  { %v170_v26 = vmax.f32 %v169_v25, 0.0 }
 0x119   :  { %v171_v28 = vadd.f32 3.2e-15, %v170_v26  ;;  %v335_v29 = vpop.f32.mrb[0].mxu1 }
 0x11a   :  { %v336_v30 = vadd.f32 %v374_v27, %v335_v29  ;;  %v398_v31 = vpop.f32.mrb[1].mxu1 }
 0x11b   :  { %v195_v32 = vsel %vm193_vm6, %v171_v28, 0.0  ;;  %v208_v33 = vsel %vm181_vm4, 1e+16, %v171_v28 }
 0x11c   :  { %v197_v34 = vsel %vm196_vm5, %v195_v32, -inf  ;;  %v209_v35 = vsel %vm196_vm5, %v208_v33, inf  ;;  %339 = vst [vmem:[#allocation11] sm:$0xff] %v336_v30 }
 0x11d   :  { %v198_v36 = vrot.slane %v197_v34, 4  ;;  %v210_v37 = vrot.slane %v209_v35, 4 }
 0x11e   :  { %501 = shalt.err (!%p498_p0)
}
 0x11f   :  { %s502_s18 = scalar_lea.hbm %s703_s9, 128 }
 0x120   :  { %p503_p1 = scmp.ne.s32.totalorder %s703_s9, %s502_s18  ;;  %p506_p2 = scmp.lt.u32.totalorder %s502_s18, %s703_s9 }
 0x122   :  { %p508_p3 = pnand %p506_p2, %p503_p1 }
 0x124   :  { %511 = shalt.err (!%p508_p3)
}
 0x125   :  { %359 = dma.vmem_to_hbm [thread:$0]  %s357_s15, 128, %s703_s9, [#allocation12]   ;;  %v199_v38 = vmax.f32 %v197_v34, %v198_v36  ;;  %v211_v39 = vmin.f32 %v209_v35, %v210_v37  ;;  %v194_v46 = vld [vmem:[#allocation2] sm:$0x1]  ;;  %v207_v47 = vld [vmem:[#allocation3] sm:$0x1] }
 0x126   :  { %s551_s9 = smov [#allocation10]  }
 0x127   :  { %v200_v40 = vrot.slane %v199_v38, 2  ;;  %v212_v41 = vrot.slane %v211_v39, 2  ;;  %s346_s23 = sshll.u32 %s551_s9, 4  ;;  %s347_s23 = int_to_ptr.vmem [resolvable:$true] %s346_s23 }
 0x128   :  { %s512_s5 = scalar_lea.vmem %s347_s23, 16  ;;  %s516_s24 = scalar_lea.vmem %s347_s23, 32 }
 0x129   :  { %v201_v42 = vmax.f32 %v199_v38, %v200_v40  ;;  %v213_v43 = vmin.f32 %v211_v39, %v212_v41  ;;  %p513_p4 = scmp.ne.s32.totalorder %s347_s23, %s512_s5  ;;  %p517_p5 = scmp.lt.s32.totalorder %s347_s23, %s347_s23 }
 0x12a   :  { %p518_p6 = scmp.lt.s32.totalorder %s516_s24, %s512_s5 }
 0x12b   :  { %v202_v44 = vrot.slane %v201_v42, 1  ;;  %v214_v45 = vrot.slane %v213_v43, 1 }
 0x12c   :  { %p519_p7 = por %p518_p6, %p517_p5 }
 0x12d   :  { %v203_v48 = vmax.f32 %v201_v42, %v202_v44  ;;  %v215_v49 = vmin.f32 %v213_v43, %v214_v45 }
 0x12e   :  { %p520_p8 = pnand %p519_p7, %p513_p4 }
 0x12f   :  { %v204_v50 = vmax.f32 %v194_v46, %v203_v48  ;;  %v216_v51 = vmin.f32 %v207_v47, %v215_v49 }
 0x131   :  { %206 = vst.msk [vmem:[#allocation2] sm:$0x1] %vm72_vm0, %v204_v50  ;;  %217 = vst.msk [vmem:[#allocation3] sm:$0x1] %vm72_vm0, %v216_v51 }
 0x138   :  { %v221_v52 = vld [vmem:[#allocation2] sm:$0x1]  ;;  %v229_v53 = vld [vmem:[#allocation3] sm:$0x1] }
 0x139   :  { %416 = vrsqrt.f32 %v221_v52  ;;  %vm224_vm7 = vcmp.eq.f32.partialorder %v221_v52, inf  ;;  %v227_v57 = vand.u32 2147483648, %v221_v52  ;;  %vm226_vm8 = vcmp.eq.f32.partialorder %v221_v52, 0.0 }
 0x13a   :  { %418 = vrsqrt.f32 %v229_v53  ;;  %vm232_vm9 = vcmp.eq.f32.partialorder %v229_v53, inf  ;;  %v235_v60 = vand.u32 2147483648, %v229_v53  ;;  %vm234_vm10 = vcmp.eq.f32.partialorder %v229_v53, 0.0 }
 0x143   :  { %v417_v54 = vpop.eup %416 }
 0x144   :  { %v419_v55 = vpop.eup %418  ;;  %v223_v56 = vmul.f32 %v417_v54, %v221_v52 }
 0x145   :  { %v231_v58 = vmul.f32 %v419_v55, %v229_v53 }
 0x146   :  { %v225_v59 = vsel %vm224_vm7, %v221_v52, %v223_v56 }
 0x147   :  { %v228_v61 = vsel %vm226_vm8, %v227_v57, %v225_v59  ;;  %v233_v62 = vsel %vm232_vm9, %v229_v53, %v231_v58 }
 0x148   :  { %v236_v63 = vsel %vm234_vm10, %v235_v60, %v233_v62 }
 0x149   :  { %v237_v0 = vsub.f32 %v228_v61, %v236_v63 }
 0x14b   :  { %v239_v1 = vand.u32 2147483647, %v237_v0  ;;  %v238_v12 = vmax.f32 %v237_v0, 0.0 }
 0x14d   :  { %v240_v2 = vsub.f32 0.0, %v239_v1 }
 0x14f   :  { %v241_v3 = vmul.f32 1.442695, %v240_v2 }
 0x151   :  { %420 = vpow2.f32 %v241_v3 }
 0x15b   :  { %v421_v4 = vpop.eup %420 }
 0x15c   :  { %v243_v5 = vadd.f32 1.0, %v421_v4  ;;  %v246_v6 = vmul.f32 -0.5, %v421_v4  ;;  %v249_v8 = vand.u32 2147483647, %v421_v4 }
 0x15e   :  { %422 = vlog2.f32 %v243_v5  ;;  %v247_v7 = vadd.f32 1.0, %v246_v6  ;;  %vm250_vm11 = vcmp.lt.f32.partialorder %v249_v8, 0.0004427343 }
 0x160   :  { %v248_v11 = vmul.f32 %v421_v4, %v247_v7 }
 0x168   :  { %v423_v9 = vpop.eup %422 }
 0x169   :  { %v245_v10 = vmul.f32 0.6931472, %v423_v9 }
 0x16b   :  { %v251_v13 = vsel %vm250_vm11, %v248_v11, %v245_v10 }
 0x16c   :  { %v252_v14 = vadd.f32 %v251_v13, %v238_v12 }
 0x16e   :  { %253 = vst.msk [vmem:[#allocation10] sm:$0x1] %vm72_vm0, %v252_v14 }
 0x16f   :  { %523 = shalt.err (!%p520_p8)
}
 0x170   :  { %s524_s27 = scalar_lea.hbm %s702_s8, 16 }
 0x171   :  { %p525_p9 = scmp.ne.s32.totalorder %s702_s8, %s524_s27  ;;  %p528_p10 = scmp.lt.u32.totalorder %s524_s27, %s702_s8 }
 0x173   :  { %p530_p11 = pnand %p528_p10, %p525_p9 }
 0x175   :  { %533 = shalt.err (!%p530_p11)
}
 0x176   :  { %349 = dma.vmem_to_hbm [thread:$0]  %s347_s23, 16, %s702_s8, [#allocation6]  }
 0x177   :  { %538 = dma.done.wait [#allocation6], 16  }
 0x178   :  { %539 = vsyncadd [#allocation6], 4294967280 }
 0x179   :  { %540 = dma.done.wait [#allocation12], 128  }
 0x17a   :  { %541 = vsyncadd [#allocation12], 4294967168 }
 0x17b   :  { %366 = vsyncpa [#allocation5], 1 }
 0x17c   :  { %367 = vsyncpa [#allocation8], 1 }
 0x17d   :  { %368 = vsyncpa [#allocation6], 1 }
 0x17e   :  { %369 = vsyncpa [#allocation12], 1 }

</bundles_post_ra>
